<compile_context>
chip_gen: v7x
topology: tpu7x:2x2x1
jax: 0.10.0
libtpu: 0.0.40
codegen_flags: <defaults>
</compile_context>

<pallas_src>
import functools

import jax
import jax.numpy as jnp
from jax.experimental import pallas as pl
from jax.experimental.pallas import tpu as pltpu

BN_EPS = 1e-5
LN_EPS = 1e-5


def _round_up(x, m):
    return ((x + m - 1) // m) * m


# --------------------------------------------------------------------------
# Kernel 1:  Z2[i] = relu( (sum_k A[i,k] @ X[k]) @ W1 + b1 ) @ W2
# --------------------------------------------------------------------------
def layer1_kernel(a_ref, x_ref, w1_ref, b1_ref, w2_ref, z_ref, acc_ref):
    k = pl.program_id(1)

    @pl.when(k == 0)
    def _():
        acc_ref[...] = jnp.zeros_like(acc_ref)

    # N^2 contraction against the (small) nfeat dim: bf16 operands, f32 acc.
    acc_ref[...] += jnp.dot(a_ref[...], x_ref[...],
                            preferred_element_type=jnp.float32)

    @pl.when(k == pl.num_programs(1) - 1)
    def _():
        ax = acc_ref[...]                                      # (TM, F) f32
        # Epilogue matmuls are small -> keep the aggregated operand in f32
        # (precision fix from the review).
        h1 = jnp.dot(ax, w1_ref[...],
                     preferred_element_type=jnp.float32) + b1_ref[...]
        h1 = jnp.maximum(h1, 0.0)                              # relu in f32
        z2 = jnp.dot(h1, w2_ref[...], preferred_element_type=jnp.float32)
        z_ref[...] = z2.astype(z_ref.dtype)


# --------------------------------------------------------------------------
# Kernel 2:  out[i] = LN( BN( relu( sum_k A[i,k] @ Z2[k] + b2 ) ) )
# vec_ref rows: 0=b2, 1=bn_scale, 2=bn_bias, 3=ln_gamma, 4=ln_beta
# --------------------------------------------------------------------------
def layer2_kernel(a_ref, z_ref, vec_ref, o_ref, acc_ref, *, nout):
    k = pl.program_id(1)

    @pl.when(k == 0)
    def _():
        acc_ref[...] = jnp.zeros_like(acc_ref)

    acc_ref[...] += jnp.dot(a_ref[...], z_ref[...],
                            preferred_element_type=jnp.float32)

    @pl.when(k == pl.num_programs(1) - 1)
    def _():
        b2 = vec_ref[0:1, :]
        bn_s = vec_ref[1:2, :]
        bn_b = vec_ref[2:3, :]
        ln_g = vec_ref[3:4, :]
        ln_b = vec_ref[4:5, :]

        h = jnp.maximum(acc_ref[...] + b2, 0.0)                # relu
        h = h * bn_s + bn_b                                    # BN (eval, folded)
        # LayerNorm over the real feature width; zero-padded lanes contribute
        # nothing to the sums.  Clamp one-pass variance at 0 (review fix).
        inv_n = 1.0 / nout
        mean = jnp.sum(h, axis=-1, keepdims=True) * inv_n
        var = jnp.sum(h * h, axis=-1, keepdims=True) * inv_n - mean * mean
        var = jnp.maximum(var, 0.0)
        hn = (h - mean) * jax.lax.rsqrt(var + LN_EPS)
        o_ref[...] = (hn * ln_g + ln_b).astype(o_ref.dtype)


# --------------------------------------------------------------------------
# Plain-JAX glue: dense D^{-1/2}(A + I)D^{-1/2} (PyG gcn_norm), built directly
# at padded shape and in the bf16 storage dtype (no extra f32 pass).
# --------------------------------------------------------------------------
def build_norm_adj_padded(edge_index, edge_weight, num_nodes, n_pad, dtype):
    row, col = edge_index[0], edge_index[1]
    loop = jnp.arange(num_nodes, dtype=edge_index.dtype)
    row = jnp.concatenate([row, loop])
    col = jnp.concatenate([col, loop])
    w = jnp.concatenate([edge_weight, jnp.ones((num_nodes,), edge_weight.dtype)])
    deg = jnp.zeros((num_nodes,), edge_weight.dtype).at[col].add(w)
    dinv = jnp.where(deg > 0, jax.lax.rsqrt(deg), 0.0)
    norm = (dinv[row] * w * dinv[col]).astype(dtype)
    # messages flow source(row) -> target(col): out = A_hat @ X, A_hat[col,row]
    a = jnp.zeros((n_pad, n_pad), dtype).at[col, row].add(norm)
    return a


def _pad2(m, rows, cols, dtype):
    m = m.astype(dtype)
    return jnp.pad(m, ((0, rows - m.shape[0]), (0, cols - m.shape[1])))


def _pad_vec(v, cols, dtype=jnp.float32):
    return _pad2(v.reshape(1, -1), 1, cols, dtype)


def _vmem_footprint(tm, tk, f_pad, h_pad, o_pad):
    # Conservative double-buffered footprint estimate covering both kernels.
    a_blk = 2 * tm * tk * 2                        # A_hat bf16, 2 buffers
    x_blk = 2 * tk * f_pad * 2                     # X bf16
    z2_blk = 2 * tk * o_pad * 4                    # Z2 f32 (kernel 2)
    weights = 2 * (f_pad * h_pad + h_pad * o_pad) * 4
    out_blk = 2 * tm * o_pad * 4
    acc = tm * max(f_pad, o_pad) * 4
    return a_blk + x_blk + z2_blk + weights + out_blk + acc


def _choose_tiles(n, f_pad, h_pad, o_pad, budget=40 * 1024 * 1024):
    n128 = _round_up(n, 128)
    if n128 <= 1024 and _vmem_footprint(n128, n128, f_pad, h_pad, o_pad) <= budget:
        return n128, n128, n128                    # small graph: one A block
    # Review-sized candidates (TM, TK), largest first; TK divides TM so one
    # pad size serves both grid axes.
    for tm, tk in ((2048, 1024), (1024, 1024), (512, 512), (256, 256), (128, 128)):
        if tm <= n128 and _vmem_footprint(tm, tk, f_pad, h_pad, o_pad) <= budget:
            return tm, tk, _round_up(n128, tm)
    return 128, 128, _round_up(n128, 128)


def gcn_forward(x, edge_index, edge_weight, params):
    n, nfeat = x.shape
    nhid = params["w1"].shape[1]
    nout = params["w2"].shape[1]

    # Lane-dense padded feature widths.
    f_pad = _round_up(nfeat, 128)
    h_pad = _round_up(nhid, 128)
    o_pad = _round_up(nout, 128)

    tm, tk, n_pad = _choose_tiles(n, f_pad, h_pad, o_pad)
    footprint = _vmem_footprint(tm, tk, f_pad, h_pad, o_pad)
    vmem_limit = int(min(max(int(footprint * 1.5), 32 * 2**20), 48 * 2**20))

    a_p = build_norm_adj_padded(edge_index, edge_weight, n, n_pad, jnp.bfloat16)
    x_p = _pad2(x, n_pad, f_pad, jnp.bfloat16)

    # Small weight panels stay f32 (precision; MXU has slack).
    w1 = _pad2(params["w1"], f_pad, h_pad, jnp.float32)
    b1 = _pad_vec(params["b1"], h_pad)
    w2 = _pad2(params["w2"], h_pad, o_pad, jnp.float32)

    # BatchNorm1d eval-mode fold using the actual running stats.  Padded
    # columns get scale/bias 0 so they stay exactly 0 through BN and LN.
    bn_scale = params["bn_g"] * jax.lax.rsqrt(params["bn_rv"] + BN_EPS)
    bn_bias = params["bn_b"] - params["bn_rm"] * bn_scale
    vec = jnp.zeros((8, o_pad), jnp.float32)
    vec = vec.at[0, :nout].set(params["b2"])
    vec = vec.at[1, :nout].set(bn_scale)
    vec = vec.at[2, :nout].set(bn_bias)
    vec = vec.at[3, :nout].set(params["ln_g"])
    vec = vec.at[4, :nout].set(params["ln_b"])

    grid = (n_pad // tm, n_pad // tk)
    cparams = pltpu.CompilerParams(
        dimension_semantics=("parallel", "arbitrary"),
        vmem_limit_bytes=vmem_limit)

    restream = n_pad // tm  # how many times the X / Z2 panels are re-read

    l1_cost = pl.CostEstimate(
        flops=int(2 * n_pad * n_pad * f_pad
                  + 2 * n_pad * f_pad * h_pad
                  + 2 * n_pad * h_pad * o_pad),
        transcendentals=0,
        bytes_accessed=int(n_pad * n_pad * 2
                           + restream * n_pad * f_pad * 2
                           + (f_pad * h_pad + h_pad * o_pad) * 4
                           + n_pad * o_pad * 4))

    l2_cost = pl.CostEstimate(
        flops=int(2 * n_pad * n_pad * o_pad + 12 * n_pad * o_pad),
        transcendentals=int(n_pad),
        bytes_accessed=int(n_pad * n_pad * 2
                           + restream * n_pad * o_pad * 4
                           + n_pad * o_pad * 4))

    # ---- layer 1 (+ fused H1 @ W2 projection) ----
    z2 = pl.pallas_call(
        layer1_kernel,
        out_shape=jax.ShapeDtypeStruct((n_pad, o_pad), jnp.float32),
        grid_spec=pltpu.PrefetchScalarGridSpec(
            num_scalar_prefetch=0,
            grid=grid,
            in_specs=[
                pl.BlockSpec((tm, tk), lambda i, k: (i, k)),        # A_hat
                pl.BlockSpec((tk, f_pad), lambda i, k: (k, 0)),     # X
                pl.BlockSpec((f_pad, h_pad), lambda i, k: (0, 0)),  # W1
                pl.BlockSpec((1, h_pad), lambda i, k: (0, 0)),      # b1
                pl.BlockSpec((h_pad, o_pad), lambda i, k: (0, 0)),  # W2
            ],
            out_specs=pl.BlockSpec((tm, o_pad), lambda i, k: (i, 0)),
            scratch_shapes=[pltpu.VMEM((tm, f_pad), jnp.float32)],
        ),
        compiler_params=cparams,
        cost_estimate=l1_cost,
    )(a_p, x_p, w1, b1, w2)

    # ---- layer 2 + BatchNorm + LayerNorm ----
    out = pl.pallas_call(
        functools.partial(layer2_kernel, nout=nout),
        out_shape=jax.ShapeDtypeStruct((n_pad, o_pad), jnp.float32),
        grid_spec=pltpu.PrefetchScalarGridSpec(
            num_scalar_prefetch=0,
            grid=grid,
            in_specs=[
                pl.BlockSpec((tm, tk), lambda i, k: (i, k)),        # A_hat
                pl.BlockSpec((tk, o_pad), lambda i, k: (k, 0)),     # Z2
                pl.BlockSpec((8, o_pad), lambda i, k: (0, 0)),      # packed vecs
            ],
            out_specs=pl.BlockSpec((tm, o_pad), lambda i, k: (i, 0)),
            scratch_shapes=[pltpu.VMEM((tm, o_pad), jnp.float32)],
        ),
        compiler_params=cparams,
        cost_estimate=l2_cost,
    )(a_p, z2, vec)

    return out[:n, :nout]


# --------------------------------------------------------------------------
# Pure-JAX reference (f32 throughout) for a correctness sanity check.
# --------------------------------------------------------------------------
def gcn_reference(x, edge_index, edge_weight, params):
    n = x.shape[0]
    row, col = edge_index[0], edge_index[1]
    loop = jnp.arange(n, dtype=edge_index.dtype)
    row = jnp.concatenate([row, loop])
    col = jnp.concatenate([col, loop])
    w = jnp.concatenate([edge_weight, jnp.ones((n,), edge_weight.dtype)])
    deg = jnp.zeros((n,), jnp.float32).at[col].add(w)
    dinv = jnp.where(deg > 0, 1.0 / jnp.sqrt(deg), 0.0)
    norm = dinv[row] * w * dinv[col]
    a = jnp.zeros((n, n), jnp.float32).at[col, row].add(norm)

    h1 = jnp.maximum(a @ (x @ params["w1"]) + params["b1"], 0.0)
    h2 = jnp.maximum(a @ (h1 @ params["w2"]) + params["b2"], 0.0)
    bn = ((h2 - params["bn_rm"]) * jax.lax.rsqrt(params["bn_rv"] + BN_EPS)
          * params["bn_g"] + params["bn_b"])
    mu = bn.mean(-1, keepdims=True)
    var = ((bn - mu) ** 2).mean(-1, keepdims=True)
    return (bn - mu) * jax.lax.rsqrt(var + LN_EPS) * params["ln_g"] + params["ln_b"]


def init_params(key, nfeat, nhid, noutput):
    k1, k2 = jax.random.split(key)

    def glorot(k, fan_in, fan_out):
        lim = jnp.sqrt(6.0 / (fan_in + fan_out))
        return jax.random.uniform(k, (fan_in, fan_out), jnp.float32, -lim, lim)

    return {
        "w1": glorot(k1, nfeat, nhid),
        "b1": jnp.zeros((nhid,), jnp.float32),
        "w2": glorot(k2, nhid, noutput),
        "b2": jnp.zeros((noutput,), jnp.float32),
        "bn_g": jnp.ones((noutput,), jnp.float32),
        "bn_b": jnp.zeros((noutput,), jnp.float32),
        "bn_rm": jnp.zeros((noutput,), jnp.float32),   # running_mean
        "bn_rv": jnp.ones((noutput,), jnp.float32),    # running_var
        "ln_g": jnp.ones((noutput,), jnp.float32),
        "ln_b": jnp.zeros((noutput,), jnp.float32),
    }


if __name__ == "__main__":
    N, NFEAT, NHID, NOUT, E = 16, 8, 32, 16, 32
    key = jax.random.PRNGKey(0)
    kx, ke, kw, kp = jax.random.split(key, 4)

    x = jax.random.normal(kx, (N, NFEAT), jnp.float32)
    edge_index = jax.random.randint(ke, (2, E), 0, N, dtype=jnp.int32)
    edge_weight = jax.random.uniform(kw, (E,), jnp.float32, 0.1, 1.0)
    params = init_params(kp, NFEAT, NHID, NOUT)

    out = gcn_forward(x, edge_index, edge_weight, params)
    jax.block_until_ready(out)
    assert out.shape == (N, NOUT)

    ref = gcn_reference(x, edge_index, edge_weight, params)
    max_err = float(jnp.max(jnp.abs(out - ref)))
    assert max_err < 8e-2, f"max abs error vs reference: {max_err}"

    print("KERNEL_OK")
</pallas_src>

<mosaic_0001>
module attributes {stable_mosaic.version = 11 : i64} {
  func.func @layer1_kernel(%arg0: i32, %arg1: i32, %arg2: memref<128x128xbf16, #tpu.memory_space<vmem>>, %arg3: memref<128x128xbf16, #tpu.memory_space<vmem>>, %arg4: memref<128x128xf32, #tpu.memory_space<vmem>>, %arg5: memref<1x128xf32, #tpu.memory_space<vmem>>, %arg6: memref<128x128xf32, #tpu.memory_space<vmem>>, %arg7: memref<128x128xf32, #tpu.memory_space<vmem>>, %arg8: memref<128x128xf32, #tpu.memory_space<vmem>>) attributes {dimension_semantics = [#tpu.dimension_semantics<parallel>, #tpu.dimension_semantics<arbitrary>], iteration_bounds = array<i64: 1, 1>, scalar_prefetch = 0 : i64, scratch_operands = 1 : i64, tpu.core_type = #tpu.core_type<tc>, window_params = [{transform_indices = @transform_0, window_bounds = array<i64: 128, 128>}, {transform_indices = @transform_1, window_bounds = array<i64: 128, 128>}, {pipeline_mode = #tpu.pipeline_mode<synchronous>, transform_indices = @transform_2, window_bounds = array<i64: 128, 128>}, {pipeline_mode = #tpu.pipeline_mode<synchronous>, transform_indices = @transform_3, window_bounds = array<i64: 1, 128>}, {pipeline_mode = #tpu.pipeline_mode<synchronous>, transform_indices = @transform_4, window_bounds = array<i64: 128, 128>}, {transform_indices = @transform_5, window_bounds = array<i64: 128, 128>}]} {
    %c0_i32 = arith.constant 0 : i32
    %0 = arith.cmpi eq, %arg1, %c0_i32 : i32
    %1 = arith.extui %0 : i1 to i32
    %c0_i32_0 = arith.constant 0 : i32
    %2 = arith.cmpi ne, %1, %c0_i32_0 : i32
    scf.if %2 {
      %cst_10 = arith.constant 0.000000e+00 : f32
      %12 = vector.broadcast %cst_10 : f32 to vector<128x128xf32>
      %c0_11 = arith.constant 0 : index
      %c0_12 = arith.constant 0 : index
      %13 = vector.load %arg8[%c0_11, %c0_12] : memref<128x128xf32, #tpu.memory_space<vmem>>, vector<128x128xf32>
      tpu.vector_store %arg8[%c0_11, %c0_12], %12 {strides = array<i32>} : memref<128x128xf32, #tpu.memory_space<vmem>>, vector<128x128xf32>,
    } else {
    }
    %c0 = arith.constant 0 : index
    %c0_1 = arith.constant 0 : index
    %3 = vector.load %arg8[%c0, %c0_1] : memref<128x128xf32, #tpu.memory_space<vmem>>, vector<128x128xf32>
    %c0_2 = arith.constant 0 : index
    %c0_3 = arith.constant 0 : index
    %4 = vector.load %arg2[%c0_2, %c0_3] : memref<128x128xbf16, #tpu.memory_space<vmem>>, vector<128x128xbf16>
    %c0_4 = arith.constant 0 : index
    %c0_5 = arith.constant 0 : index
    %5 = vector.load %arg3[%c0_4, %c0_5] : memref<128x128xbf16, #tpu.memory_space<vmem>>, vector<128x128xbf16>
    %cst = arith.constant dense<0.000000e+00> : vector<128x128xf32>
    %6 = tpu.matmul %4, %5, %cst {dimension_numbers = #tpu.dot_dimension_numbers<[1], [0], [0], [1], [0, 0, 1, 1], [], []>} : vector<128x128xbf16>, vector<128x128xbf16>, vector<128x128xf32> -> vector<128x128xf32>
    %7 = arith.addf %3, %6 : vector<128x128xf32>
    %c0_6 = arith.constant 0 : index
    %c0_7 = arith.constant 0 : index
    %8 = vector.load %arg8[%c0_6, %c0_7] : memref<128x128xf32, #tpu.memory_space<vmem>>, vector<128x128xf32>
    tpu.vector_store %arg8[%c0_6, %c0_7], %7 {strides = array<i32>} : memref<128x128xf32, #tpu.memory_space<vmem>>, vector<128x128xf32>,
    %c0_i32_8 = arith.constant 0 : i32
    %9 = arith.cmpi eq, %arg1, %c0_i32_8 : i32
    %10 = arith.extui %9 : i1 to i32
    %c0_i32_9 = arith.constant 0 : i32
    %11 = arith.cmpi ne, %10, %c0_i32_9 : i32
    scf.if %11 {
      %c0_10 = arith.constant 0 : index
      %c0_11 = arith.constant 0 : index
      %12 = vector.load %arg8[%c0_10, %c0_11] : memref<128x128xf32, #tpu.memory_space<vmem>>, vector<128x128xf32>
      %c0_12 = arith.constant 0 : index
      %c0_13 = arith.constant 0 : index
      %13 = vector.load %arg4[%c0_12, %c0_13] : memref<128x128xf32, #tpu.memory_space<vmem>>, vector<128x128xf32>
      %cst_14 = arith.constant dense<0.000000e+00> : vector<128x128xf32>
      %14 = tpu.matmul %12, %13, %cst_14 {dimension_numbers = #tpu.dot_dimension_numbers<[1], [0], [0], [1], [0, 0, 1, 1], [], []>} : vector<128x128xf32>, vector<128x128xf32>, vector<128x128xf32> -> vector<128x128xf32>
      %c0_15 = arith.constant 0 : index
      %c0_16 = arith.constant 0 : index
      %15 = vector.load %arg5[%c0_15, %c0_16] : memref<1x128xf32, #tpu.memory_space<vmem>>, vector<1x128xf32>
      %16 = vector.broadcast %15 : vector<1x128xf32> to vector<128x128xf32>
      %17 = arith.addf %14, %16 : vector<128x128xf32>
      %cst_17 = arith.constant 0.000000e+00 : f32
      %18 = vector.broadcast %cst_17 : f32 to vector<128x128xf32>
      %19 = arith.maximumf %17, %18 : vector<128x128xf32>
      %c0_18 = arith.constant 0 : index
      %c0_19 = arith.constant 0 : index
      %20 = vector.load %arg6[%c0_18, %c0_19] : memref<128x128xf32, #tpu.memory_space<vmem>>, vector<128x128xf32>
      %cst_20 = arith.constant dense<0.000000e+00> : vector<128x128xf32>
      %21 = tpu.matmul %19, %20, %cst_20 {dimension_numbers = #tpu.dot_dimension_numbers<[1], [0], [0], [1], [0, 0, 1, 1], [], []>} : vector<128x128xf32>, vector<128x128xf32>, vector<128x128xf32> -> vector<128x128xf32>
      %c0_21 = arith.constant 0 : index
      %c0_22 = arith.constant 0 : index
      %22 = vector.load %arg7[%c0_21, %c0_22] : memref<128x128xf32, #tpu.memory_space<vmem>>, vector<128x128xf32>
      tpu.vector_store %arg7[%c0_21, %c0_22], %21 {strides = array<i32>} : memref<128x128xf32, #tpu.memory_space<vmem>>, vector<128x128xf32>,
    } else {
    }
    return
  }
  func.func @transform_0(%arg0: i32, %arg1: i32) -> (i32, i32) {
    %c0_i32 = arith.constant 0 : i32
    return %arg0, %arg1 : i32, i32
  }
  func.func @transform_1(%arg0: i32, %arg1: i32) -> (i32, i32) {
    %c0_i32 = arith.constant 0 : i32
    %c0_i32_0 = arith.constant 0 : i32
    return %arg1, %c0_i32 : i32, i32
  }
  func.func @transform_2(%arg0: i32, %arg1: i32) -> (i32, i32) {
    %c0_i32 = arith.constant 0 : i32
    %c0_i32_0 = arith.constant 0 : i32
    %c0_i32_1 = arith.constant 0 : i32
    return %c0_i32, %c0_i32_0 : i32, i32
  }
  func.func @transform_3(%arg0: i32, %arg1: i32) -> (i32, i32) {
    %c0_i32 = arith.constant 0 : i32
    %c0_i32_0 = arith.constant 0 : i32
    %c0_i32_1 = arith.constant 0 : i32
    return %c0_i32, %c0_i32_0 : i32, i32
  }
  func.func @transform_4(%arg0: i32, %arg1: i32) -> (i32, i32) {
    %c0_i32 = arith.constant 0 : i32
    %c0_i32_0 = arith.constant 0 : i32
    %c0_i32_1 = arith.constant 0 : i32
    return %c0_i32, %c0_i32_0 : i32, i32
  }
  func.func @transform_5(%arg0: i32, %arg1: i32) -> (i32, i32) {
    %c0_i32 = arith.constant 0 : i32
    %c0_i32_0 = arith.constant 0 : i32
    return %arg0, %c0_i32 : i32, i32
  }
}

</mosaic_0001>

<bundles_post_ra>
// kernel: tpu_custom_call.1
= control target key start
LH: loop header
LB: loop body
LE: loop exit
PB: predicated region body
PF: predicated region fallthrough
CT: control target
= control target key end

     0   :  { %10 = vsyncpa [#allocation4], 0  ;;  %s1351_s0 = inlined_call_operand.hbm [shape: bf16[128,128], index: 0, kind: input, shape index: {}]   ;;  %s1352_s1 = inlined_call_operand.hbm [shape: bf16[128,128], index: 1, kind: input, shape index: {}]   ;;  %s1353_s2 = inlined_call_operand.hbm [shape: f32[128,128], index: 2, kind: input, shape index: {}]   ;;  %s1354_s3 = inlined_call_operand.vmem [shape: f32[1,128], index: 3, kind: input, shape index: {}]   ;;  %s1355_s4 = inlined_call_operand.hbm [shape: f32[128,128], index: 4, kind: input, shape index: {}]   ;;  %s1356_s5 = inlined_call_operand.hbm [shape: f32[128,128], index: 5, kind: output, shape index: {}]  }
   0x1   :  { %11 = vsyncpa [#allocation7], 0 }
   0x2   :  { %12 = vsyncpa [#allocation10], 0 }
   0x3   :  { %13 = vsyncpa [#allocation5], 0  ;;  %s1233_s18 = smov [#allocation6]   ;;  %s1234_s20 = smov [#allocation3]  }
   0x4   :  { %s31_s19 = sshll.u32 %s1233_s18, 4  ;;  %s19_s21 = sshll.u32 %s1234_s20, 4  ;;  %s32_s19 = int_to_ptr.vmem [resolvable:$true] %s31_s19  ;;  %s1272_s21 = int_to_ptr.vmem [resolvable:$true] %s19_s21 }
   0x5   :  { %s1115_s24 = scalar_lea.hbm %s1352_s1, 1024 }
   0x6   :  { %p1116_p0 = scmp.ne.s32.totalorder %s1352_s1, %s1115_s24  ;;  %p1119_p1 = scmp.lt.u32.totalorder %s1115_s24, %s1352_s1 }
   0x8   :  { %p1121_p2 = pnand %p1119_p1, %p1116_p0 }
   0xa   :  { %1124 = shalt.err (!%p1121_p2)
}
   0xb   :  { %s1125_s29 = scalar_lea.vmem %s32_s19, 1024  ;;  %p1130_p4 = scmp.lt.s32.totalorder %s32_s19, %s32_s19 }
   0xc   :  { %p1126_p3 = scmp.ne.s32.totalorder %s32_s19, %s1125_s29  ;;  %p1131_p5 = scmp.lt.s32.totalorder %s1125_s29, %s1125_s29 }
   0xe   :  { %p1132_p6 = por %p1131_p5, %p1130_p4 }
  0x10   :  { %p1133_p7 = pnand %p1132_p6, %p1126_p3 }
  0x12   :  { %1136 = shalt.err (!%p1133_p7)
}
  0x13   :  { %s1235_s30 = smov 64   ;;  %s1236_s6 = smov 4  }
  0x14   :  { %37 = dma.hbm_to_vmem [thread:$0]  %s1352_s1, 1024, %s32_s19, [#allocation7], %s1235_s30, %s1235_s30, %s1236_s6  }
  0x15   :  { %s1137_s11 = scalar_lea.hbm %s1351_s0, 1024 }
  0x16   :  { %p1138_p8 = scmp.ne.s32.totalorder %s1351_s0, %s1137_s11  ;;  %p1141_p9 = scmp.lt.u32.totalorder %s1137_s11, %s1351_s0 }
  0x18   :  { %p1143_p10 = pnand %p1141_p9, %p1138_p8 }
  0x1a   :  { %1146 = shalt.err (!%p1143_p10)
}
  0x1b   :  { %s1147_s16 = scalar_lea.vmem %s1272_s21, 1024  ;;  %p1152_p12 = scmp.lt.s32.totalorder %s1272_s21, %s1272_s21 }
  0x1c   :  { %p1148_p11 = scmp.ne.s32.totalorder %s1272_s21, %s1147_s16  ;;  %p1153_p13 = scmp.lt.s32.totalorder %s1147_s16, %s1147_s16 }
  0x1e   :  { %p1154_p0 = por %p1153_p13, %p1152_p12 }
  0x20   :  { %p1155_p1 = pnand %p1154_p0, %p1148_p11 }
  0x22   :  { %1158 = shalt.err (!%p1155_p1)
}
  0x23   :  { %25 = dma.hbm_to_vmem [thread:$0]  %s1351_s0, 1024, %s1272_s21, [#allocation4], %s1235_s30, %s1235_s30, %s1236_s6  }
  0x24   :  { %s1237_s18 = smov [#allocation8]   ;;  %s1159_s23 = scalar_lea.hbm %s1353_s2, 2048 }
  0x25   :  { %s43_s19 = sshll.u32 %s1237_s18, 4  ;;  %p1160_p2 = scmp.ne.s32.totalorder %s1353_s2, %s1159_s23  ;;  %s44_s19 = int_to_ptr.vmem [resolvable:$true] %s43_s19 }
  0x26   :  { %p1163_p3 = scmp.lt.u32.totalorder %s1159_s23, %s1353_s2 }
  0x28   :  { %p1165_p4 = pnand %p1163_p3, %p1160_p2 }
  0x2a   :  { %1168 = shalt.err (!%p1165_p4)
}
  0x2b   :  { %s1169_s28 = scalar_lea.vmem %s44_s19, 2048  ;;  %p1174_p6 = scmp.lt.s32.totalorder %s44_s19, %s44_s19 }
  0x2c   :  { %p1170_p5 = scmp.ne.s32.totalorder %s44_s19, %s1169_s28  ;;  %p1175_p7 = scmp.lt.s32.totalorder %s1169_s28, %s1169_s28 }
  0x2e   :  { %p1176_p8 = por %p1175_p7, %p1174_p6 }
  0x30   :  { %p1177_p9 = pnand %p1176_p8, %p1170_p5 }
  0x32   :  { %1180 = shalt.err (!%p1177_p9)
}
  0x33   :  { %s1238_s0 = smov 128   ;;  %s1239_s21 = smov 8  }
  0x34   :  { %49 = dma.hbm_to_vmem [thread:$0]  %s1353_s2, 2048, %s44_s19, [#allocation7], %s1238_s0, %s1238_s0, %s1239_s21  }
  0x35   :  { %s1240_s6 = smov [#allocation9]   ;;  %s1181_s10 = scalar_lea.hbm %s1355_s4, 2048 }
  0x36   :  { %s57_s7 = sshll.u32 %s1240_s6, 4  ;;  %p1182_p10 = scmp.ne.s32.totalorder %s1355_s4, %s1181_s10  ;;  %s58_s7 = int_to_ptr.vmem [resolvable:$true] %s57_s7 }
  0x37   :  { %p1185_p11 = scmp.lt.u32.totalorder %s1181_s10, %s1355_s4 }
  0x39   :  { %p1187_p12 = pnand %p1185_p11, %p1182_p10 }
  0x3b   :  { %1190 = shalt.err (!%p1187_p12)
}
  0x3c   :  { %s1191_s15 = scalar_lea.vmem %s58_s7, 2048  ;;  %p1196_p0 = scmp.lt.s32.totalorder %s58_s7, %s58_s7 }
  0x3d   :  { %p1192_p13 = scmp.ne.s32.totalorder %s58_s7, %s1191_s15  ;;  %p1197_p1 = scmp.lt.s32.totalorder %s1191_s15, %s1191_s15 }
  0x3f   :  { %p1198_p2 = por %p1197_p1, %p1196_p0 }
  0x41   :  { %p1199_p3 = pnand %p1198_p2, %p1192_p13 }
  0x43   :  { %1202 = shalt.err (!%p1199_p3)
}
  0x44   :  { %63 = dma.hbm_to_vmem [thread:$0]  %s1355_s4, 2048, %s58_s7, [#allocation10], %s1238_s0, %s1238_s0, %s1239_s21  }
  0x45   :  { %1225 = dma.done.wait [#allocation4], 1024  }
  0x46   :  { %1226 = vsyncadd [#allocation4], 4294966272 }
  0x47   :  { %1227 = dma.done.wait [#allocation7], 3072  }
  0x48   :  { %1228 = vsyncadd [#allocation7], 4294964224 }
  0x49   :  { %1229 = dma.done.wait [#allocation10], 2048  }
  0x4a   :  { %1230 = vsyncadd [#allocation10], 4294965248  ;;  %v1099_v0 = vld [vmem:[#allocation6] sm:$0xff]   ;;  %v1100_v1 = vld [vmem:[#allocation6 + $0x8] sm:$0xff]  }
  0x4b   :  { %866 = vmatprep.subr.bf16.mxu0 %v1099_v0  ;;  %v1101_v2 = vld [vmem:[#allocation6 + $0x10] sm:$0xff]   ;;  %v1102_v3 = vld [vmem:[#allocation6 + $0x18] sm:$0xff]   ;;  %v1107_v4 = vld [vmem:[#allocation3] sm:$0xff]  }
  0x4c   :  { %867 = vmatpush3.bf16.msra.mxu0 %v1099_v0  ;;  %882 = vmatprep.mubr.bf16.mxu0 %v1107_v4  ;;  %v1103_v5 = vld [vmem:[#allocation6 + $0x20] sm:$0xff]   ;;  %v1104_v6 = vld [vmem:[#allocation6 + $0x28] sm:$0xff]   ;;  %v391_v9 = vld [vmem:[#allocation8 + $0x10] sm:$0xff] }
  0x4d   :  { %868 = vmatprep.subr.bf16.mxu0 %v1100_v1  ;;  %v389_v7 = vld [vmem:[#allocation8] sm:$0xff]  ;;  %v390_v8 = vld [vmem:[#allocation8 + $0x8] sm:$0xff]  ;;  %v392_v11 = vld [vmem:[#allocation8 + $0x18] sm:$0xff] }
  0x4e   :  { %v1010_v10 = vpack.c.bf16 %v390_v8, %v389_v7  ;;  %v1014_v12 = vpack.c.bf16 %v392_v11, %v391_v9  ;;  %v393_v13 = vld [vmem:[#allocation8 + $0x20] sm:$0xff]  ;;  %v394_v14 = vld [vmem:[#allocation8 + $0x28] sm:$0xff]  ;;  %v1105_v15 = vld [vmem:[#allocation6 + $0x30] sm:$0xff]  }
  0x4f   :  { %v1018_v16 = vpack.c.bf16 %v394_v14, %v393_v13  ;;  %v395_v17 = vld [vmem:[#allocation8 + $0x30] sm:$0xff]  ;;  %v396_v18 = vld [vmem:[#allocation8 + $0x38] sm:$0xff]  ;;  %v397_v21 = vld [vmem:[#allocation8 + $0x40] sm:$0xff] }
  0x50   :  { %869 = vmatpush3.bf16.msra.mxu0 %v1100_v1  ;;  %1011 = vmatprep.subr.bf16.mxu1 %v1010_v10  ;;  %v1106_v19 = vld [vmem:[#allocation6 + $0x38] sm:$0xff]   ;;  %v1022_v20 = vpack.c.bf16 %v396_v18, %v395_v17  ;;  %v398_v22 = vld [vmem:[#allocation8 + $0x48] sm:$0xff]  ;;  %v399_v25 = vld [vmem:[#allocation8 + $0x50] sm:$0xff] }
  0x51   :  { %870 = vmatprep.subr.bf16.mxu0 %v1101_v2  ;;  %1013 = vmatpush3.bf16.msra.mxu1 %v1010_v10  ;;  %v1026_v23 = vpack.c.bf16 %v398_v22, %v397_v21  ;;  %v1108_v24 = vld [vmem:[#allocation3 + $0x8] sm:$0xff]   ;;  %v400_v26 = vld [vmem:[#allocation8 + $0x58] sm:$0xff]  ;;  %v1109_v27 = vld [vmem:[#allocation3 + $0x10] sm:$0xff]  }
  0x52   :  { %1015 = vmatprep.subr.bf16.mxu1 %v1014_v12  ;;  %v1030_v28 = vpack.c.bf16 %v400_v26, %v399_v25  ;;  %v401_v29 = vld [vmem:[#allocation8 + $0x60] sm:$0xff]  ;;  %v402_v30 = vld [vmem:[#allocation8 + $0x68] sm:$0xff]  ;;  %v1110_v32 = vld [vmem:[#allocation3 + $0x18] sm:$0xff]  }
  0x53   :  { %v1034_v31 = vpack.c.bf16 %v402_v30, %v401_v29  ;;  %v1111_v33 = vld [vmem:[#allocation3 + $0x20] sm:$0xff]   ;;  %v1112_v34 = vld [vmem:[#allocation3 + $0x28] sm:$0xff]   ;;  %v1113_v35 = vld [vmem:[#allocation3 + $0x30] sm:$0xff]  }
  0x54   :  { %871 = vmatpush3.bf16.msra.mxu0 %v1101_v2  ;;  %v1114_v36 = vld [vmem:[#allocation3 + $0x38] sm:$0xff]   ;;  %v403_v37 = vld [vmem:[#allocation8 + $0x70] sm:$0xff]  ;;  %v573_v40 = vld [vmem:[#allocation9] sm:$0xff] }
  0x55   :  { %872 = vmatprep.subr.bf16.mxu0 %v1102_v3  ;;  %1017 = vmatpush3.bf16.msra.mxu1 %v1014_v12  ;;  %v404_v38 = vld [vmem:[#allocation8 + $0x78] sm:$0xff]  ;;  %v574_v41 = vld [vmem:[#allocation9 + $0x8] sm:$0xff]  ;;  %v575_v42 = vld [vmem:[#allocation9 + $0x10] sm:$0xff] }
  0x56   :  { %1019 = vmatprep.subr.bf16.mxu1 %v1018_v16  ;;  %v1038_v39 = vpack.c.bf16 %v404_v38, %v403_v37  ;;  %v1042_v43 = vpack.c.bf16 %v574_v41, %v573_v40  ;;  %v576_v44 = vld [vmem:[#allocation9 + $0x18] sm:$0xff]  ;;  %v577_v46 = vld [vmem:[#allocation9 + $0x20] sm:$0xff]  ;;  %v578_v47 = vld [vmem:[#allocation9 + $0x28] sm:$0xff] }
  0x57   :  { %v1046_v45 = vpack.c.bf16 %v576_v44, %v575_v42  ;;  %v1050_v48 = vpack.c.bf16 %v578_v47, %v577_v46  ;;  %v579_v49 = vld [vmem:[#allocation9 + $0x30] sm:$0xff]  ;;  %v580_v50 = vld [vmem:[#allocation9 + $0x38] sm:$0xff]  ;;  %v581_v52 = vld [vmem:[#allocation9 + $0x40] sm:$0xff] }
  0x58   :  { %873 = vmatpush3.bf16.msra.mxu0 %v1102_v3  ;;  %v1054_v51 = vpack.c.bf16 %v580_v50, %v579_v49  ;;  %v582_v53 = vld [vmem:[#allocation9 + $0x48] sm:$0xff]  ;;  %v583_v55 = vld [vmem:[#allocation9 + $0x50] sm:$0xff]  ;;  %v584_v56 = vld [vmem:[#allocation9 + $0x58] sm:$0xff] }
  0x59   :  { %874 = vmatprep.subr.bf16.mxu0 %v1103_v5  ;;  %1021 = vmatpush3.bf16.msra.mxu1 %v1018_v16  ;;  %v1058_v54 = vpack.c.bf16 %v582_v53, %v581_v52  ;;  %v1062_v57 = vpack.c.bf16 %v584_v56, %v583_v55  ;;  %v585_v58 = vld [vmem:[#allocation9 + $0x60] sm:$0xff]  ;;  %v586_v59 = vld [vmem:[#allocation9 + $0x68] sm:$0xff]  ;;  %v587_v13 = vld [vmem:[#allocation9 + $0x70] sm:$0xff] }
  0x5a   :  { %1023 = vmatprep.subr.bf16.mxu1 %v1022_v20  ;;  %v1066_v60 = vpack.c.bf16 %v586_v59, %v585_v58  ;;  %v588_v14 = vld [vmem:[#allocation9 + $0x78] sm:$0xff]  ;;  %v785_v16 = vld [vmem:[%s1354_s3] ss:$0 sm:$0xff]  ;;  %s1241_s3 = smov [#allocation11]  }
  0x5b   :  { %s755_s17 = sshll.u32 %s1241_s3, 4  ;;  %s756_s17 = int_to_ptr.vmem [resolvable:$true] %s755_s17 }
  0x5c   :  { %875 = vmatpush3.bf16.msra.mxu0 %v1103_v5  ;;  %s1203_s18 = scalar_lea.vmem %s756_s17, 2048  ;;  %p1208_p5 = scmp.lt.s32.totalorder %s756_s17, %s756_s17 }
  0x5d   :  { %876 = vmatprep.subr.bf16.mxu0 %v1104_v6  ;;  %1025 = vmatpush3.bf16.msra.mxu1 %v1022_v20  ;;  %p1204_p4 = scmp.ne.s32.totalorder %s756_s17, %s1203_s18  ;;  %p1209_p6 = scmp.lt.s32.totalorder %s1203_s18, %s1203_s18 }
  0x5e   :  { %1027 = vmatprep.subr.bf16.mxu1 %v1026_v23 }
  0x5f   :  { %p1210_p7 = por %p1209_p6, %p1208_p5 }
  0x60   :  { %877 = vmatpush3.bf16.msra.mxu0 %v1104_v6 }
  0x61   :  { %878 = vmatprep.subr.bf16.mxu0 %v1105_v15  ;;  %1029 = vmatpush3.bf16.msra.mxu1 %v1026_v23  ;;  %p1211_p8 = pnand %p1210_p7, %p1204_p4 }
  0x62   :  { %1031 = vmatprep.subr.bf16.mxu1 %v1030_v28 }
  0x64   :  { %879 = vmatpush3.bf16.msra.mxu0 %v1105_v15  ;;  %v1070_v15 = vpack.c.bf16 %v588_v14, %v587_v13 }
  0x65   :  { %880 = vmatprep.subr.bf16.mxu0 %v1106_v19  ;;  %1033 = vmatpush3.bf16.msra.mxu1 %v1030_v28 }
  0x66   :  { %1035 = vmatprep.subr.bf16.mxu1 %v1034_v31 }
  0x68   :  { %881 = vmatpush3.bf16.msra.mxu0 %v1106_v19 }
  0x69   :  { %1037 = vmatpush3.bf16.msra.mxu1 %v1034_v31  ;;  %1043 = vmatprep.subr.bf16.mxu0 %v1042_v43 }
  0x6a   :  { %1039 = vmatprep.subr.bf16.mxu1 %v1038_v39 }
  0x6b   :  { %883 = vmatmul.mubr.bf16.vlgmr.msra.gmra.mrb[0].mxu0 %v1108_v24 }
  0x6c   :  { %886 = vmatprep.mubr.bf16.mxu0 %v1109_v27  ;;  %1045 = vmatpush3.bf16.msra.mxu0 %v1042_v43 }
  0x6d   :  { %1041 = vmatpush3.bf16.msra.mxu1 %v1038_v39  ;;  %1047 = vmatprep.subr.bf16.mxu0 %v1046_v45 }
  0x6e   :  { %1074 = vmatprep.subr.bf16.mxu1 %v1042_v43 }
  0x70   :  { %1049 = vmatpush3.bf16.msra.mxu0 %v1046_v45 }
  0x71   :  { %1051 = vmatprep.subr.bf16.mxu0 %v1050_v48 }
  0x73   :  { %887 = vmatmul.mubr.bf16.gmra.mrb[4].mxu0 %v1110_v32 }
  0x74   :  { %890 = vmatprep.mubr.bf16.mxu0 %v1111_v33  ;;  %1053 = vmatpush3.bf16.msra.mxu0 %v1050_v48 }
  0x75   :  { %1055 = vmatprep.subr.bf16.mxu0 %v1054_v51 }
  0x78   :  { %1057 = vmatpush3.bf16.msra.mxu0 %v1054_v51 }
  0x79   :  { %1059 = vmatprep.subr.bf16.mxu0 %v1058_v54 }
  0x7b   :  { %891 = vmatmul.mubr.bf16.gmra.mrb[8].mxu0 %v1112_v34 }
  0x7c   :  { %894 = vmatprep.mubr.bf16.mxu0 %v1113_v35  ;;  %1061 = vmatpush3.bf16.msra.mxu0 %v1058_v54 }
  0x7d   :  { %1063 = vmatprep.subr.bf16.mxu0 %v1062_v57 }
  0x80   :  { %1065 = vmatpush3.bf16.msra.mxu0 %v1062_v57 }
  0x81   :  { %1067 = vmatprep.subr.bf16.mxu0 %v1066_v60 }
  0x83   :  { %895 = vmatmul.mubr.bf16.gmra.mrb[12].mxu0 %v1114_v36 }
  0x84   :  { %1069 = vmatpush3.bf16.msra.mxu0 %v1066_v60 }
  0x85   :  { %1071 = vmatprep.subr.bf16.mxu0 %v1070_v15 }
  0x88   :  { %1073 = vmatpush3.bf16.msra.mxu0 %v1070_v15 }
 0x13e   :  { %v884_v61 = vpop.f32.mrb[0].mxu0 }
 0x13f   :  { %v275_v62 = vpop.f32.mrb[1].mxu0 }
 0x140   :  { %v885_v63 = vpop.f32.mrb[2].mxu0  ;;  %930 = vmatprep.mubr.f32.mxu1 %v275_v62 }
 0x141   :  { %v278_v0 = vpop.f32.mrb[3].mxu0 }
 0x142   :  { %931 = vmatmul.mubr.f32.vlgmr.msra.gmra.mrb[0].mxu1 %v278_v0 }
 0x143   :  { %933 = vmatprep.mubr.f32.mxu1 %v884_v61  ;;  %1082 = vmatpush3.bf16.msra.mxu1 %v1042_v43 }
 0x144   :  { %1075 = vmatprep.subr.bf16.mxu1 %v1046_v45 }
 0x146   :  { %v888_v1 = vpop.f32.mrb[4].mxu0  ;;  %934 = vmatmul.mubr.f32.gmra.mrb[2].mxu1 %v885_v63 }
 0x147   :  { %v291_v2 = vpop.f32.mrb[5].mxu0  ;;  %1083 = vmatpush3.bf16.msra.mxu1 %v1046_v45 }
 0x148   :  { %v889_v3 = vpop.f32.mrb[6].mxu0  ;;  %936 = vmatprep.mubr.f32.mxu1 %v291_v2  ;;  %1076 = vmatprep.subr.bf16.mxu1 %v1050_v48 }
 0x149   :  { %v294_v4 = vpop.f32.mrb[7].mxu0 }
 0x14a   :  { %937 = vmatmul.mubr.f32.gmra.mrb[4].mxu1 %v294_v4 }
 0x14b   :  { %939 = vmatprep.mubr.f32.mxu1 %v888_v1  ;;  %1084 = vmatpush3.bf16.msra.mxu1 %v1050_v48 }
 0x14c   :  { %1077 = vmatprep.subr.bf16.mxu1 %v1054_v51 }
 0x14e   :  { %v892_v5 = vpop.f32.mrb[8].mxu0  ;;  %940 = vmatmul.mubr.f32.gmra.mrb[6].mxu1 %v889_v3 }
 0x14f   :  { %v307_v6 = vpop.f32.mrb[9].mxu0  ;;  %1085 = vmatpush3.bf16.msra.mxu1 %v1054_v51 }
 0x150   :  { %v893_v7 = vpop.f32.mrb[10].mxu0  ;;  %942 = vmatprep.mubr.f32.mxu1 %v307_v6  ;;  %1078 = vmatprep.subr.bf16.mxu1 %v1058_v54 }
 0x151   :  { %v310_v8 = vpop.f32.mrb[11].mxu0 }
 0x152   :  { %943 = vmatmul.mubr.f32.gmra.mrb[8].mxu1 %v310_v8 }
 0x153   :  { %945 = vmatprep.mubr.f32.mxu1 %v892_v5  ;;  %1086 = vmatpush3.bf16.msra.mxu1 %v1058_v54 }
 0x154   :  { %1079 = vmatprep.subr.bf16.mxu1 %v1062_v57 }
 0x156   :  { %v896_v9 = vpop.f32.mrb[12].mxu0  ;;  %946 = vmatmul.mubr.f32.gmra.mrb[10].mxu1 %v893_v7 }
 0x157   :  { %v323_v10 = vpop.f32.mrb[13].mxu0  ;;  %1087 = vmatpush3.bf16.msra.mxu1 %v1062_v57 }
 0x158   :  { %v897_v11 = vpop.f32.mrb[14].mxu0  ;;  %948 = vmatprep.mubr.f32.mxu1 %v323_v10  ;;  %1080 = vmatprep.subr.bf16.mxu1 %v1066_v60 }
 0x159   :  { %v326_v12 = vpop.f32.mrb[15].mxu0 }
 0x15a   :  { %949 = vmatmul.mubr.f32.gmra.mrb[12].mxu1 %v326_v12 }
 0x15b   :  { %951 = vmatprep.mubr.f32.mxu1 %v896_v9  ;;  %1088 = vmatpush3.bf16.msra.mxu1 %v1066_v60 }
 0x15c   :  { %1081 = vmatprep.subr.bf16.mxu1 %v1070_v15 }
 0x15e   :  { %952 = vmatmul.mubr.f32.gmra.mrb[14].mxu1 %v897_v11 }
 0x15f   :  { %1089 = vmatpush3.bf16.msra.mxu1 %v1070_v15 }
 0x215   :  { %v932_v17 = vpop.f32.mrb[0].mxu1 }
 0x216   :  { %v484_v18 = vadd.f32 %v932_v17, %v785_v16  ;;  %v478_v19 = vpop.f32.mrb[1].mxu1 }
 0x217   :  { %v479_v20 = vadd.f32 %v785_v16, %v478_v19 }
 0x218   :  { %v558_v23 = vmax.f32 %v484_v18, 0.0 }
 0x219   :  { %v557_v21 = vmax.f32 %v479_v20, 0.0  ;;  %v935_v22 = vpop.f32.mrb[2].mxu1 }
 0x21a   :  { %v494_v24 = vadd.f32 %v935_v22, %v785_v16  ;;  %v488_v25 = vpop.f32.mrb[3].mxu1 }
 0x21b   :  { %v489_v26 = vadd.f32 %v785_v16, %v488_v25  ;;  %986 = vmatprep.mubr.f32.mxu0 %v557_v21 }
 0x21c   :  { %987 = vmatmul.mubr.f32.vlgmr.msra.gmra.mrb[16].mxu0 %v558_v23  ;;  %v560_v29 = vmax.f32 %v494_v24, 0.0 }
 0x21d   :  { %v559_v27 = vmax.f32 %v489_v26, 0.0  ;;  %v938_v28 = vpop.f32.mrb[4].mxu1 }
 0x21e   :  { %v504_v30 = vadd.f32 %v938_v28, %v785_v16  ;;  %v498_v31 = vpop.f32.mrb[5].mxu1 }
 0x21f   :  { %v499_v32 = vadd.f32 %v785_v16, %v498_v31  ;;  %989 = vmatprep.mubr.f32.mxu0 %v559_v27 }
 0x220   :  { %990 = vmatmul.mubr.f32.gmra.mrb[18].mxu0 %v560_v29  ;;  %v562_v35 = vmax.f32 %v504_v30, 0.0 }
 0x221   :  { %v561_v33 = vmax.f32 %v499_v32, 0.0  ;;  %v941_v34 = vpop.f32.mrb[6].mxu1 }
 0x222   :  { %v514_v36 = vadd.f32 %v941_v34, %v785_v16  ;;  %v508_v37 = vpop.f32.mrb[7].mxu1 }
 0x223   :  { %v509_v38 = vadd.f32 %v785_v16, %v508_v37  ;;  %992 = vmatprep.mubr.f32.mxu0 %v561_v33 }
 0x224   :  { %993 = vmatmul.mubr.f32.gmra.mrb[20].mxu0 %v562_v35  ;;  %v564_v41 = vmax.f32 %v514_v36, 0.0 }
 0x225   :  { %v563_v39 = vmax.f32 %v509_v38, 0.0  ;;  %v944_v40 = vpop.f32.mrb[8].mxu1 }
 0x226   :  { %v524_v42 = vadd.f32 %v944_v40, %v785_v16  ;;  %v518_v43 = vpop.f32.mrb[9].mxu1 }
 0x227   :  { %v519_v44 = vadd.f32 %v785_v16, %v518_v43  ;;  %995 = vmatprep.mubr.f32.mxu0 %v563_v39 }
 0x228   :  { %996 = vmatmul.mubr.f32.gmra.mrb[22].mxu0 %v564_v41  ;;  %v566_v47 = vmax.f32 %v524_v42, 0.0 }
 0x229   :  { %v565_v45 = vmax.f32 %v519_v44, 0.0  ;;  %v947_v46 = vpop.f32.mrb[10].mxu1 }
 0x22a   :  { %v534_v48 = vadd.f32 %v947_v46, %v785_v16  ;;  %v528_v49 = vpop.f32.mrb[11].mxu1 }
 0x22b   :  { %v529_v50 = vadd.f32 %v785_v16, %v528_v49  ;;  %998 = vmatprep.mubr.f32.mxu1 %v565_v45 }
 0x22c   :  { %999 = vmatmul.mubr.f32.vlgmr.msra.gmra.mrb[16].mxu1 %v566_v47  ;;  %v568_v53 = vmax.f32 %v534_v48, 0.0 }
 0x22d   :  { %v567_v51 = vmax.f32 %v529_v50, 0.0  ;;  %v950_v52 = vpop.f32.mrb[12].mxu1 }
 0x22e   :  { %v544_v54 = vadd.f32 %v950_v52, %v785_v16  ;;  %v538_v55 = vpop.f32.mrb[13].mxu1 }
 0x22f   :  { %v539_v56 = vadd.f32 %v785_v16, %v538_v55  ;;  %1001 = vmatprep.mubr.f32.mxu1 %v567_v51 }
 0x230   :  { %1002 = vmatmul.mubr.f32.gmra.mrb[18].mxu1 %v568_v53  ;;  %v570_v59 = vmax.f32 %v544_v54, 0.0 }
 0x231   :  { %v569_v57 = vmax.f32 %v539_v56, 0.0  ;;  %v953_v58 = vpop.f32.mrb[14].mxu1 }
 0x232   :  { %v554_v60 = vadd.f32 %v953_v58, %v785_v16  ;;  %v548_v61 = vpop.f32.mrb[15].mxu1 }
 0x233   :  { %v549_v62 = vadd.f32 %v785_v16, %v548_v61  ;;  %1004 = vmatprep.mubr.f32.mxu1 %v569_v57 }
 0x234   :  { %1005 = vmatmul.mubr.f32.gmra.mrb[20].mxu1 %v570_v59  ;;  %v572_v0 = vmax.f32 %v554_v60, 0.0 }
 0x235   :  { %v571_v63 = vmax.f32 %v549_v62, 0.0 }
 0x237   :  { %1007 = vmatprep.mubr.f32.mxu1 %v571_v63 }
 0x238   :  { %1008 = vmatmul.mubr.f32.gmra.mrb[22].mxu1 %v572_v0 }
 0x2ef   :  { %v988_v1 = vpop.f32.mrb[16].mxu0 }
 0x2f0   :  { %735 = vst [vmem:[#allocation11 + $0x8] sm:$0xff] %v988_v1  ;;  %v655_v2 = vpop.f32.mrb[17].mxu0 }
 0x2f1   :  { %734 = vst [vmem:[#allocation11] sm:$0xff] %v655_v2 }
 0x2f3   :  { %v991_v3 = vpop.f32.mrb[18].mxu0 }
 0x2f4   :  { %737 = vst [vmem:[#allocation11 + $0x18] sm:$0xff] %v991_v3  ;;  %v665_v4 = vpop.f32.mrb[19].mxu0 }
 0x2f5   :  { %736 = vst [vmem:[#allocation11 + $0x10] sm:$0xff] %v665_v4 }
 0x2f7   :  { %v994_v5 = vpop.f32.mrb[20].mxu0 }
 0x2f8   :  { %739 = vst [vmem:[#allocation11 + $0x28] sm:$0xff] %v994_v5  ;;  %v675_v6 = vpop.f32.mrb[21].mxu0 }
 0x2f9   :  { %738 = vst [vmem:[#allocation11 + $0x20] sm:$0xff] %v675_v6 }
 0x2fb   :  { %v997_v7 = vpop.f32.mrb[22].mxu0 }
 0x2fc   :  { %741 = vst [vmem:[#allocation11 + $0x38] sm:$0xff] %v997_v7  ;;  %v685_v8 = vpop.f32.mrb[23].mxu0 }
 0x2fd   :  { %740 = vst [vmem:[#allocation11 + $0x30] sm:$0xff] %v685_v8 }
 0x2ff   :  { %v1000_v9 = vpop.f32.mrb[16].mxu1 }
 0x300   :  { %743 = vst [vmem:[#allocation11 + $0x48] sm:$0xff] %v1000_v9  ;;  %v695_v10 = vpop.f32.mrb[17].mxu1 }
 0x301   :  { %742 = vst [vmem:[#allocation11 + $0x40] sm:$0xff] %v695_v10 }
 0x303   :  { %v1003_v11 = vpop.f32.mrb[18].mxu1 }
 0x304   :  { %745 = vst [vmem:[#allocation11 + $0x58] sm:$0xff] %v1003_v11  ;;  %v705_v12 = vpop.f32.mrb[19].mxu1 }
 0x305   :  { %744 = vst [vmem:[#allocation11 + $0x50] sm:$0xff] %v705_v12 }
 0x307   :  { %v1006_v13 = vpop.f32.mrb[20].mxu1 }
 0x308   :  { %747 = vst [vmem:[#allocation11 + $0x68] sm:$0xff] %v1006_v13  ;;  %v715_v14 = vpop.f32.mrb[21].mxu1 }
 0x309   :  { %746 = vst [vmem:[#allocation11 + $0x60] sm:$0xff] %v715_v14 }
 0x30b   :  { %v1009_v15 = vpop.f32.mrb[22].mxu1 }
 0x30c   :  { %749 = vst [vmem:[#allocation11 + $0x78] sm:$0xff] %v1009_v15  ;;  %v725_v16 = vpop.f32.mrb[23].mxu1 }
 0x30d   :  { %748 = vst [vmem:[#allocation11 + $0x70] sm:$0xff] %v725_v16 }
 0x30e   :  { %1214 = shalt.err (!%p1211_p8)
}
 0x30f   :  { %s1215_s22 = scalar_lea.hbm %s1356_s5, 2048 }
 0x310   :  { %p1216_p9 = scmp.ne.s32.totalorder %s1356_s5, %s1215_s22  ;;  %p1219_p10 = scmp.lt.u32.totalorder %s1215_s22, %s1356_s5 }
 0x312   :  { %p1221_p11 = pnand %p1219_p10, %p1216_p9 }
 0x314   :  { %1224 = shalt.err (!%p1221_p11)
}
 0x315   :  { %761 = dma.vmem_to_hbm [thread:$0]  %s756_s17, 2048, %s1356_s5, [#allocation5], %s1238_s0, %s1238_s0, %s1239_s21  }
 0x316   :  { %1231 = dma.done.wait [#allocation5], 2048  }
 0x317   :  { %1232 = vsyncadd [#allocation5], 4294965248 }
 0x318   :  { %765 = vsyncpa [#allocation4], 1 }
 0x319   :  { %766 = vsyncpa [#allocation7], 1 }
 0x31a   :  { %767 = vsyncpa [#allocation10], 1 }
 0x31b   :  { %768 = vsyncpa [#allocation5], 1 }

</bundles_post_ra>
